<compile_context>
chip_gen: v7x
topology: tpu7x:2x2x1
jax: 0.10.0
libtpu: 0.0.40
codegen_flags: <defaults>
</compile_context>

<pallas_src>
import math
import functools

import jax
import jax.numpy as jnp
from jax.experimental import pallas as pl
from jax.experimental.pallas import tpu as pltpu


# ----------------------------------------------------------------------------
# Tiling helpers
# ----------------------------------------------------------------------------
def _pick_tile(dim, preferred, align):
    """Largest tile <= `preferred` that divides `dim` and is a multiple of
    `align`; falls back to the full extent (always a legal BlockSpec)."""
    if dim <= preferred:
        return dim
    t = (preferred // align) * align
    while t >= align:
        if dim % t == 0:
            return t
        t -= align
    return dim


def _pick_group(bh, preferred, n_q):
    """Head-group size: largest divisor of `bh` <= `preferred` that keeps the
    product of the two 'parallel' grid axes (bh//g * n_q) >= 2 when possible
    (keeps both v7x TensorCores busy)."""
    divs = [g for g in range(1, min(bh, max(preferred, 1)) + 1) if bh % g == 0]
    good = [g for g in divs if (bh // g) * n_q >= 2]
    pool = good if good else divs
    return max(pool) if pool else 1


def _vmem_limit(est_bytes):
    """Explicit scoped-VMEM limit: >= 32 MiB (raises v5e's 16 MiB default),
    grows with the computed working set, capped comfortably under all chips'
    physical VMEM for the tile sizes used here."""
    return int(min(100 << 20, max(int(est_bytes) + (8 << 20), 32 << 20)))


def _is_bf16(dtype):
    return jnp.dtype(dtype) == jnp.dtype(jnp.bfloat16)


# ----------------------------------------------------------------------------
# Linear kernel bodies (blocks arrive already in the compute dtype; the only
# cast is the f32 bias add / final downcast).
# ----------------------------------------------------------------------------
def _linear_fullk_kernel(x_ref, w_ref, b_ref, o_ref):
    acc = jnp.dot(x_ref[...], w_ref[...], preferred_element_type=jnp.float32)
    o_ref[...] = (acc + b_ref[...].astype(jnp.float32)).astype(o_ref.dtype)


def _linear_tiledk_kernel(x_ref, w_ref, b_ref, o_ref, acc_ref, *, k_axis):
    k = pl.program_id(k_axis)

    @pl.when(k == 0)
    def _():
        acc_ref[...] = jnp.zeros_like(acc_ref)

    acc_ref[...] += jnp.dot(x_ref[...], w_ref[...],
                            preferred_element_type=jnp.float32)

    @pl.when(k == pl.num_programs(k_axis) - 1)
    def _():
        o_ref[...] = (acc_ref[...] + b_ref[...].astype(jnp.float32)
                      ).astype(o_ref.dtype)


# ----------------------------------------------------------------------------
# Plain linear:  y = x @ W_t + b      (W_t = PyTorch weight, pre-transposed)
# ----------------------------------------------------------------------------
def pallas_linear(x2d, w_t, b, *, out_dtype=None,
                  tm_pref=512, tn_pref=256, tk_pref=512, full_k_max=2048):
    M, Din = x2d.shape
    Dout = w_t.shape[-1]
    out_dtype = out_dtype if out_dtype is not None else x2d.dtype
    in_sz = jnp.dtype(x2d.dtype).itemsize
    out_sz = jnp.dtype(out_dtype).itemsize
    sub_align = 16 if _is_bf16(x2d.dtype) else 8

    tm = _pick_tile(M, tm_pref, sub_align)
    tn = _pick_tile(Dout, tn_pref, 128)
    b2 = b.reshape(1, Dout)

    if Din <= full_k_max:
        # Full-K block: no reduction axis, no accumulator scratch, no pl.when.
        grid = (M // tm, Dout // tn)
        kern = _linear_fullk_kernel
        in_specs = [
            pl.BlockSpec((tm, Din), lambda i, j: (i, 0)),
            pl.BlockSpec((Din, tn), lambda i, j: (0, j)),
            pl.BlockSpec((1, tn), lambda i, j: (0, j)),
        ]
        out_specs = pl.BlockSpec((tm, tn), lambda i, j: (i, j))
        scratch = []
        semantics = ("parallel", "parallel")
        est = 2 * (tm * Din + Din * tn + tn) * in_sz + 2 * tm * tn * out_sz
    else:
        tk = _pick_tile(Din, tk_pref, 128)
        grid = (M // tm, Dout // tn, Din // tk)
        kern = functools.partial(_linear_tiledk_kernel, k_axis=2)
        in_specs = [
            pl.BlockSpec((tm, tk), lambda i, j, k: (i, k)),
            pl.BlockSpec((tk, tn), lambda i, j, k: (k, j)),
            pl.BlockSpec((1, tn), lambda i, j, k: (0, j)),
        ]
        out_specs = pl.BlockSpec((tm, tn), lambda i, j, k: (i, j))
        scratch = [pltpu.VMEM((tm, tn), jnp.float32)]
        semantics = ("parallel", "parallel", "arbitrary")
        est = (2 * (tm * tk + tk * tn + tn) * in_sz
               + 2 * tm * tn * out_sz + tm * tn * 4)

    return pl.pallas_call(
        kern,
        out_shape=jax.ShapeDtypeStruct((M, Dout), out_dtype),
        grid_spec=pltpu.PrefetchScalarGridSpec(
            num_scalar_prefetch=0,
            grid=grid,
            in_specs=in_specs,
            out_specs=out_specs,
            scratch_shapes=scratch,
        ),
        compiler_params=pltpu.CompilerParams(
            dimension_semantics=semantics,
            vmem_limit_bytes=_vmem_limit(est)),
    )(x2d, w_t, b2)


# ----------------------------------------------------------------------------
# Fused Q/K/V projection.  Weights are stored stacked as (3, Din, D) and the
# output is written as (3, M, D): Q/K/V become contiguous leading-dim slices
# (free) instead of strided lane slices of a (M, 3D) tensor.
# ----------------------------------------------------------------------------
def pallas_qkv_proj(x2d, w_qkv, b_qkv, *, out_dtype=None,
                    tm_pref=512, tn_pref=256, tk_pref=512, full_k_max=2048):
    M, Din = x2d.shape
    C, _, Dout = w_qkv.shape
    out_dtype = out_dtype if out_dtype is not None else x2d.dtype
    in_sz = jnp.dtype(x2d.dtype).itemsize
    out_sz = jnp.dtype(out_dtype).itemsize
    sub_align = 16 if _is_bf16(x2d.dtype) else 8

    tm = _pick_tile(M, tm_pref, sub_align)
    tn = _pick_tile(Dout, tn_pref, 128)

    if Din <= full_k_max:
        grid = (C, M // tm, Dout // tn)
        kern = _linear_fullk_kernel
        in_specs = [
            pl.BlockSpec((tm, Din), lambda c, i, j: (i, 0)),
            pl.BlockSpec((None, Din, tn), lambda c, i, j: (c, 0, j)),
            pl.BlockSpec((None, 1, tn), lambda c, i, j: (c, 0, j)),
        ]
        out_specs = pl.BlockSpec((None, tm, tn), lambda c, i, j: (c, i, j))
        scratch = []
        semantics = ("parallel", "parallel", "parallel")
        est = 2 * (tm * Din + Din * tn + tn) * in_sz + 2 * tm * tn * out_sz
    else:
        tk = _pick_tile(Din, tk_pref, 128)
        grid = (C, M // tm, Dout // tn, Din // tk)
        kern = functools.partial(_linear_tiledk_kernel, k_axis=3)
        in_specs = [
            pl.BlockSpec((tm, tk), lambda c, i, j, k: (i, k)),
            pl.BlockSpec((None, tk, tn), lambda c, i, j, k: (c, k, j)),
            pl.BlockSpec((None, 1, tn), lambda c, i, j, k: (c, 0, j)),
        ]
        out_specs = pl.BlockSpec((None, tm, tn), lambda c, i, j, k: (c, i, j))
        scratch = [pltpu.VMEM((tm, tn), jnp.float32)]
        semantics = ("parallel", "parallel", "parallel", "arbitrary")
        est = (2 * (tm * tk + tk * tn + tn) * in_sz
               + 2 * tm * tn * out_sz + tm * tn * 4)

    return pl.pallas_call(
        kern,
        out_shape=jax.ShapeDtypeStruct((C, M, Dout), out_dtype),
        grid_spec=pltpu.PrefetchScalarGridSpec(
            num_scalar_prefetch=0,
            grid=grid,
            in_specs=in_specs,
            out_specs=out_specs,
            scratch_shapes=scratch,
        ),
        compiler_params=pltpu.CompilerParams(
            dimension_semantics=semantics,
            vmem_limit_bytes=_vmem_limit(est)),
    )(x2d, w_qkv, b_qkv)


# ----------------------------------------------------------------------------
# Flash-style attention over groups of G heads with a KV-tile reduction axis:
#   softmax(Q K^T) V  (the 1/sqrt(d_k) scale is pre-folded into wq/bq),
#   online softmax with m/l/acc VMEM scratch.
# ----------------------------------------------------------------------------
def _flash_attn_kernel(q_ref, k_ref, v_ref, o_ref, m_sc, l_sc, acc_sc,
                       *, compute_dtype, approx_recip):
    kv_idx = pl.program_id(2)

    @pl.when(kv_idx == 0)
    def _():
        m_sc[...] = jnp.full_like(m_sc, -jnp.inf)
        l_sc[...] = jnp.zeros_like(l_sc)
        acc_sc[...] = jnp.zeros_like(acc_sc)

    q = q_ref[...]                                  # (G, tq, dk)
    k = k_ref[...]                                  # (G, tk, dk)
    v = v_ref[...]                                  # (G, tk, dk)
    if q.dtype != compute_dtype:
        q = q.astype(compute_dtype)
    if k.dtype != compute_dtype:
        k = k.astype(compute_dtype)
    if v.dtype != compute_dtype:
        v = v.astype(compute_dtype)

    s = jnp.einsum("gqd,gkd->gqk", q, k,
                   preferred_element_type=jnp.float32)        # (G, tq, tk)

    m_prev = m_sc[...]
    m_new = jnp.maximum(m_prev, jnp.max(s, axis=-1, keepdims=True))
    alpha = jnp.exp(m_prev - m_new)
    p = jnp.exp(s - m_new)
    l_sc[...] = alpha * l_sc[...] + jnp.sum(p, axis=-1, keepdims=True)
    acc_sc[...] = alpha * acc_sc[...] + jnp.einsum(
        "gqk,gkd->gqd", p.astype(compute_dtype), v,
        preferred_element_type=jnp.float32)
    m_sc[...] = m_new

    @pl.when(kv_idx == pl.num_programs(2) - 1)
    def _():
        inv_l = pl.reciprocal(l_sc[...], approx=approx_recip)
        o_ref[...] = (acc_sc[...] * inv_l).astype(o_ref.dtype)


def pallas_flash_attention(q, k, v, *, compute_dtype=jnp.float32,
                           out_dtype=None, group_pref=8,
                           q_tile=256, kv_tile_pref=512,
                           kv_resident_budget=24 << 20):
    # q, k, v: (B*H, S, d_k); scale already folded into q at projection time.
    BH, S, dk = q.shape
    out_dtype = out_dtype if out_dtype is not None else q.dtype
    in_sz = jnp.dtype(q.dtype).itemsize
    out_sz = jnp.dtype(out_dtype).itemsize
    sub_align = 16 if _is_bf16(compute_dtype) else 8

    tq = _pick_tile(S, q_tile, sub_align)
    n_q = S // tq
    G = _pick_group(BH, group_pref, n_q)

    # If the double-buffered K+V block for a head group fits the budget, keep
    # the whole K/V resident across the q loop (kv grid axis collapses to 1,
    # its block index no longer depends on qi -> no re-streaming from HBM).
    kv_full_bytes = 2 * 2 * G * S * dk * in_sz
    if kv_full_bytes <= kv_resident_budget:
        tk = S
    else:
        tk = _pick_tile(S, kv_tile_pref, 128)
    grid = (BH // G, n_q, S // tk)

    approx = _is_bf16(compute_dtype)
    kern = functools.partial(_flash_attn_kernel,
                             compute_dtype=compute_dtype,
                             approx_recip=bool(approx))

    qo_spec_in = pl.BlockSpec((G, tq, dk), lambda g, qi, ki: (g, qi, 0))
    kv_spec = pl.BlockSpec((G, tk, dk), lambda g, qi, ki: (g, ki, 0))
    out_spec = pl.BlockSpec((G, tq, dk), lambda g, qi, ki: (g, qi, 0))

    est = (2 * G * (tq * dk + 2 * tk * dk) * in_sz       # q + k + v blocks (x2)
           + 2 * G * tq * dk * out_sz                     # output block (x2)
           + G * tq * (dk + 2) * 4)                       # f32 scratch

    return pl.pallas_call(
        kern,
        out_shape=jax.ShapeDtypeStruct((BH, S, dk), out_dtype),
        grid_spec=pltpu.PrefetchScalarGridSpec(
            num_scalar_prefetch=0,
            grid=grid,
            in_specs=[qo_spec_in, kv_spec, kv_spec],
            out_specs=out_spec,
            scratch_shapes=[
                pltpu.VMEM((G, tq, 1), jnp.float32),   # running max m
                pltpu.VMEM((G, tq, 1), jnp.float32),   # running denom l
                pltpu.VMEM((G, tq, dk), jnp.float32),  # running numerator acc
            ],
        ),
        compiler_params=pltpu.CompilerParams(
            dimension_semantics=("parallel", "parallel", "arbitrary"),
            vmem_limit_bytes=_vmem_limit(est)),
    )(q, k, v)


# ----------------------------------------------------------------------------
# One-time parameter preparation (done at init time, NOT per forward call):
#   * stack Q/K/V weights into (3, D, D), biases into (3, 1, D)
#   * fold 1/sqrt(d_k) into wq / bq
#   * cast weights once to the compute dtype (bf16 for the fast path);
#     biases stay f32 (added after f32 accumulation).
# ----------------------------------------------------------------------------
def prepare_params(params, num_heads, d_model, compute_dtype=jnp.float32):
    d_k = d_model // num_heads
    scale = 1.0 / math.sqrt(d_k)
    w_qkv = jnp.stack(
        [params["wq_t"] * scale, params["wk_t"], params["wv_t"]],
        axis=0).astype(compute_dtype)                              # (3, D, D)
    b_qkv = jnp.stack(
        [params["bq"] * scale, params["bk"], params["bv"]],
        axis=0).reshape(3, 1, d_model).astype(jnp.float32)         # (3, 1, D)
    return {
        "w_qkv": w_qkv,
        "b_qkv": b_qkv,
        "wo_t": params["wo_t"].astype(compute_dtype),
        "bo": params["bo"].astype(jnp.float32),
        "compute_dtype": jnp.dtype(compute_dtype),
    }


# ----------------------------------------------------------------------------
# Full module forward (glue = reshapes / contiguous slices only)
# ----------------------------------------------------------------------------
def multi_head_attention(x, prepared, num_heads):
    B, S, D = x.shape
    d_k = D // num_heads
    cdt = prepared["compute_dtype"]

    x2d = x.reshape(B * S, D)
    if x2d.dtype != cdt:
        x2d = x2d.astype(cdt)

    # Fused Q/K/V projection: one pass over x, output written as (3, B*S, D)
    # so the per-tensor slices below are contiguous leading-dim slices (free).
    qkv = pallas_qkv_proj(x2d, prepared["w_qkv"], prepared["b_qkv"],
                          out_dtype=cdt)

    # Reproduce the module's reshape exactly:
    # (B, S, D) -> (B, H, S, d_k) with NO head transpose, then flatten (B, H).
    Qh = qkv[0].reshape(B * num_heads, S, d_k)
    Kh = qkv[1].reshape(B * num_heads, S, d_k)
    Vh = qkv[2].reshape(B * num_heads, S, d_k)

    attn = pallas_flash_attention(Qh, Kh, Vh, compute_dtype=cdt, out_dtype=cdt)

    # .contiguous().view(B, S, D) is a plain row-major reshape.
    attn2d = attn.reshape(B * S, D)
    out = pallas_linear(attn2d, prepared["wo_t"], prepared["bo"],
                        out_dtype=x.dtype)
    return out.reshape(B, S, D)


# ----------------------------------------------------------------------------
# Pure-JAX reference (same semantics) for correctness checking
# ----------------------------------------------------------------------------
def mha_reference(x, params, num_heads):
    B, S, D = x.shape
    d_k = D // num_heads
    Q = x @ params["wq_t"] + params["bq"]
    K = x @ params["wk_t"] + params["bk"]
    V = x @ params["wv_t"] + params["bv"]
    Qh = Q.reshape(B, num_heads, S, d_k)
    Kh = K.reshape(B, num_heads, S, d_k)
    Vh = V.reshape(B, num_heads, S, d_k)
    s = jnp.einsum("bhqd,bhkd->bhqk", Qh, Kh) / math.sqrt(d_k)
    p = jax.nn.softmax(s, axis=-1)
    o = jnp.einsum("bhqk,bhkd->bhqd", p, Vh).reshape(B, S, D)
    return o @ params["wo_t"] + params["bo"]


if __name__ == "__main__":
    B, S, D, H = 2, 8, 32, 4  # batch, seq, d_model, num_heads

    key = jax.random.PRNGKey(0)
    keys = jax.random.split(key, 9)
    bound = 1.0 / math.sqrt(D)  # PyTorch nn.Linear default init range

    def u(k, shape):
        return jax.random.uniform(k, shape, jnp.float32, -bound, bound)

    # Weights stored pre-transposed (in_features, out_features) so the kernel
    # computes y = x @ W_t + b, matching PyTorch's y = x @ W.T + b.
    params = {
        "wq_t": u(keys[0], (D, D)), "bq": u(keys[1], (D,)),
        "wk_t": u(keys[2], (D, D)), "bk": u(keys[3], (D,)),
        "wv_t": u(keys[4], (D, D)), "bv": u(keys[5], (D,)),
        "wo_t": u(keys[6], (D, D)), "bo": u(keys[7], (D,)),
    }
    x = jax.random.normal(keys[8], (B, S, D), jnp.float32)

    ref = mha_reference(x, params, H)

    # f32 path: numerically faithful to the module; checked tightly.
    prep_f32 = prepare_params(params, H, D, compute_dtype=jnp.float32)
    out = multi_head_attention(x, prep_f32, H)
    out = jax.block_until_ready(out)
    assert out.shape == (B, S, D)
    assert jnp.allclose(out, ref, atol=2e-4, rtol=2e-4), "f32 mismatch vs reference"

    # bf16 path (f32 accumulation): weights cast once at init, bf16
    # intermediates between kernels; checked at bf16-appropriate tolerance.
    prep_bf16 = prepare_params(params, H, D, compute_dtype=jnp.bfloat16)
    out_bf16 = multi_head_attention(x, prep_bf16, H)
    out_bf16 = jax.block_until_ready(out_bf16)
    assert jnp.allclose(out_bf16.astype(jnp.float32), ref,
                        atol=5e-2, rtol=5e-2), "bf16 mismatch vs reference"

    print("KERNEL_OK")
</pallas_src>

<mosaic_0001>
module attributes {stable_mosaic.version = 11 : i64} {
  func.func @_linear_fullk_kernel(%arg0: i32, %arg1: i32, %arg2: i32, %arg3: memref<16x32xf32, #tpu.memory_space<vmem>>, %arg4: memref<1x32x32xf32, #tpu.memory_space<vmem>>, %arg5: memref<1x1x32xf32, #tpu.memory_space<vmem>>, %arg6: memref<1x16x32xf32, #tpu.memory_space<vmem>>) attributes {dimension_semantics = [#tpu.dimension_semantics<parallel>, #tpu.dimension_semantics<parallel>, #tpu.dimension_semantics<parallel>], iteration_bounds = array<i64: 3, 1, 1>, scalar_prefetch = 0 : i64, scratch_operands = 0 : i64, tpu.core_type = #tpu.core_type<tc>, window_params = [{transform_indices = @transform_0, window_bounds = array<i64: 16, 32>}, {transform_indices = @transform_1, window_bounds = array<i64: 1, 32, 32>}, {transform_indices = @transform_2, window_bounds = array<i64: 1, 1, 32>}, {transform_indices = @transform_3, window_bounds = array<i64: 1, 16, 32>}]} {
    %c0 = arith.constant 0 : index
    %c0_0 = arith.constant 0 : index
    %0 = vector.load %arg3[%c0, %c0_0] : memref<16x32xf32, #tpu.memory_space<vmem>>, vector<16x32xf32>
    %c0_1 = arith.constant 0 : index
    %c0_2 = arith.constant 0 : index
    %c0_3 = arith.constant 0 : index
    %1 = vector.load %arg4[%c0_1, %c0_2, %c0_3] : memref<1x32x32xf32, #tpu.memory_space<vmem>>, vector<1x32x32xf32>
    %2 = vector.shape_cast %1 : vector<1x32x32xf32> to vector<32x32xf32>
    %cst = arith.constant dense<0.000000e+00> : vector<16x32xf32>
    %3 = tpu.matmul %0, %2, %cst {dimension_numbers = #tpu.dot_dimension_numbers<[1], [0], [0], [1], [0, 0, 1, 1], [], []>} : vector<16x32xf32>, vector<32x32xf32>, vector<16x32xf32> -> vector<16x32xf32>
    %c0_4 = arith.constant 0 : index
    %c0_5 = arith.constant 0 : index
    %c0_6 = arith.constant 0 : index
    %4 = vector.load %arg5[%c0_4, %c0_5, %c0_6] : memref<1x1x32xf32, #tpu.memory_space<vmem>>, vector<1x1x32xf32>
    %5 = vector.shape_cast %4 : vector<1x1x32xf32> to vector<1x32xf32>
    %6 = vector.broadcast %5 : vector<1x32xf32> to vector<16x32xf32>
    %7 = arith.addf %3, %6 : vector<16x32xf32>
    %c0_7 = arith.constant 0 : index
    %c0_8 = arith.constant 0 : index
    %c0_9 = arith.constant 0 : index
    %8 = vector.load %arg6[%c0_7, %c0_8, %c0_9] : memref<1x16x32xf32, #tpu.memory_space<vmem>>, vector<1x16x32xf32>
    %9 = vector.shape_cast %8 : vector<1x16x32xf32> to vector<16x32xf32>
    %10 = vector.shape_cast %7 : vector<16x32xf32> to vector<1x16x32xf32>
    tpu.vector_store %arg6[%c0_7, %c0_8, %c0_9], %10 {strides = array<i32>} : memref<1x16x32xf32, #tpu.memory_space<vmem>>, vector<1x16x32xf32>,
    return
  }
  func.func @transform_0(%arg0: i32, %arg1: i32, %arg2: i32) -> (i32, i32) {
    %c0_i32 = arith.constant 0 : i32
    %c0_i32_0 = arith.constant 0 : i32
    return %arg1, %c0_i32 : i32, i32
  }
  func.func @transform_1(%arg0: i32, %arg1: i32, %arg2: i32) -> (i32, i32, i32) {
    %c0_i32 = arith.constant 0 : i32
    %c0_i32_0 = arith.constant 0 : i32
    return %arg0, %c0_i32, %arg2 : i32, i32, i32
  }
  func.func @transform_2(%arg0: i32, %arg1: i32, %arg2: i32) -> (i32, i32, i32) {
    %c0_i32 = arith.constant 0 : i32
    %c0_i32_0 = arith.constant 0 : i32
    return %arg0, %c0_i32, %arg2 : i32, i32, i32
  }
  func.func @transform_3(%arg0: i32, %arg1: i32, %arg2: i32) -> (i32, i32, i32) {
    %c0_i32 = arith.constant 0 : i32
    return %arg0, %arg1, %arg2 : i32, i32, i32
  }
}

</mosaic_0001>

<bundles_post_ra>
// kernel: tpu_custom_call.1
= control target key start
LH: loop header
LB: loop body
LE: loop exit
PB: predicated region body
PF: predicated region fallthrough
CT: control target
= control target key end

     0   :  { %8 = vsyncpa [#allocation3], 0  ;;  %s1025_s0 = inlined_call_operand.hbm [shape: f32[16,32], index: 0, kind: input, shape index: {}]   ;;  %s1026_s1 = inlined_call_operand.hbm [shape: f32[3,32,32], index: 1, kind: input, shape index: {}]   ;;  %s1027_s2 = inlined_call_operand.vmem [shape: f32[3,1,32], index: 2, kind: input, shape index: {}]   ;;  %s1028_s3 = inlined_call_operand.hbm [shape: f32[3,16,32], index: 3, kind: output, shape index: {}]  }
   0x1   :  { %9 = vsyncpa [#allocation6], 0 }
   0x2   :  { %11 = vsyncpa [#allocation6 + $0x1], 0 }
   0x3   :  { %12 = vsyncpa [#allocation4], 0 }
   0x4   :  { %14 = vsyncpa [#allocation4 + $0x1], 0  ;;  %s792_s12 = smov 0   ;;  %s794_s13 = smov 0  }
   0x5   :  { %s796_s14 = smov 0   ;;  %s798_s15 = smov 0  }
   0x6   :  { %s800_s16 = smov 0   ;;  %s802_s17 = smov 0  }
   0x7 LB: > { %s495_s18 = sadd.s32 4294967295, %s763_s17   ;;  %s496_s19 = sadd.s32 4294967294, %s763_s17   ;;  %s763_s17 = sphi %s802_s17, %s20_s17   ;;  %s759_s16 = sphi %s800_s16, %s1051_s16   ;;  %s755_s15 = sphi %s798_s15, %s1050_s15   ;;  %s751_s14 = sphi %s796_s14, %s1049_s14   ;;  %s747_s13 = sphi %s794_s13, %s1048_s13   ;;  %s743_s12 = sphi %s792_s12, %s1047_s12  }
   0x8   : > { %p87_p0 = scmp.ne.s32.totalorder %s747_s13, %s743_s12  ;;  %p826_p1 = scmp.eq.s32.totalorder %s495_s18, 0 }
   0x9   : > { %p830_p2 = scmp.eq.s32.totalorder %s495_s18, 2  ;;  %p149_p3 = scmp.eq.s32.totalorder %s496_s19, 2 }
   0xa   : > { %s1033_s20 = scalar_select %p826_p1, 1, 0 }
   0xb   : > { %s1034_s21 = scalar_select %p830_p2, 1, 0 }
   0xc   : > { %p836_p4 = por %p826_p1, %p87_p0  ;;  %p497_p5 = scmp.ge.s32.totalorder %s763_s17, 1 }
   0xd   : > { %p841_p6 = por %p149_p3, %p87_p0  ;;  %p156_p7 = scmp.lt.s32.totalorder %s763_s17, 4 }
   0xe   : > { %s1035_s22 = scalar_select %p836_p4, 1, 0 }
   0xf   : > { %s1036_s23 = scalar_select %p841_p6, 1, 0 }
  0x10   : > { %p846_p8 = pnand %p497_p5, %p156_p7  ;;  %s765_s25 = smov [#allocation2]  }
  0x11   : > { %s171_s26 = sshll.u32 %s765_s25, 4  ;;  %s39_s28 = sadd.s32 1, %s759_s16  ;;  %s172_s26 = int_to_ptr.vmem [resolvable:$true] %s171_s26 }
  0x12   : > { %s1037_s24 = scalar_select %p846_p8, 1, 0 }
  0x13   : > { %p550_p9 = pneg %p846_p8  ;;  %s619_s4 = scalar_lea.hbm %s1025_s0, 256 }
  0x14   : > { %p620_p11 = scmp.ne.s32.totalorder %s1025_s0, %s619_s4  ;;  %p626_p3 = scmp.lt.u32.totalorder %s619_s4, %s1025_s0 }
  0x15   : > { %p854_p10 = pnand %p550_p9, %p826_p1 }
  0x17   : > { %p621_p12 = pneg %p854_p10 }
  0x19   : > { %p622_p13 = pnand %p621_p12, %p620_p11 }
  0x1b   : > { %p623_p0 = pneg %p622_p13 }
  0x1d   : > { %p628_p5 = pnand %p626_p3, %p623_p0 }
  0x1f   : > { %631 = shalt.err (!%p628_p5)
}
  0x20   : > { %s632_s9 = scalar_lea.vmem %s172_s26, 256  ;;  %p640_p4 = scmp.lt.s32.totalorder %s172_s26, %s172_s26 }
  0x21   : > { %p633_p7 = scmp.ne.s32.totalorder %s172_s26, %s632_s9  ;;  %p641_p1 = scmp.lt.s32.totalorder %s632_s9, %s632_s9 }
  0x23   : > { %p635_p9 = pnand %p633_p7, %p621_p12  ;;  %p642_p8 = por %p641_p1, %p640_p4 }
  0x25   : > { %p636_p6 = pneg %p635_p9 }
  0x27   : > { %p643_p2 = pnand %p642_p8, %p636_p6 }
  0x29   : > { %646 = shalt.err (!%p643_p2)
}
  0x2a   : > { %s766_s10 = smov 128   ;;  %s767_s11 = smov 8  }
  0x2b   : > { %553 = dma.hbm_to_vmem [thread:$0]  (!%p854_p10), %s1025_s0, 256, %s172_s26, [#allocation3], %s766_s10, %s766_s10, %s767_s11  }
  0x2c   : > { %p41_p1 = scmp.ge.s32.totalorder %s39_s28, 3  ;;  %s74_s25 = sadd.s32 1, %s751_s14 }
  0x2d   : > { %p81_p2 = scmp.ne.s32.totalorder %s751_s14, %s747_s13  ;;  %p82_p4 = scmp.eq.s32.totalorder %s763_s17, 0 }
  0x2e   : > { %s1053_s28 = smov (%p41_p1, %s39_s28), 0  ;;  %p1040_p8 = scmp.ne.s32.totalorder %s1034_s21, 0 }
  0x2f   : > { %p884_p6 = por %p82_p4, %p81_p2  ;;  %s69_s30 = ssub.s32 %s759_s16, %s1053_s28 }
  0x30   : > { %p890_p11 = por %p1040_p8, %p81_p2  ;;  %p563_p12 = scmp.lt.s32.totalorder %s763_s17, 3 }
  0x31   : > { %p72_p10 = scmp.eq.s32.totalorder %s69_s30, 0  ;;  %s185_s26 = sand.u32 1, %s751_s14  }
  0x32   : > { %s500_s4 = sshll.u32 %s185_s26, 5  ;;  %s515_s6 = sshll.u32 %s759_s16, 9 }
  0x33   : > { %s899_s5 = scalar_select %p72_p10, %s751_s14, %s74_s25  }
  0x34   : > { %s905_s9 = scalar_lea.hbm %s1026_s1, %s515_s6  ;;  %s189_s21 = scalar_lea.vmem [#allocation5], %s500_s4 }
  0x35   : > { %s197_s18 = sshll.u32 %s189_s21, 4  ;;  %p911_p13 = pnand %p563_p12, %p884_p6  ;;  %s907_s18 = int_to_ptr.vmem [resolvable:$true] %s197_s18 }
  0x36   : > { %s915_s25 = scalar_lea.sflag [#allocation6], %s185_s26  ;;  %s647_s30 = scalar_lea.hbm %s905_s9, 512 }
  0x37   : > { %p648_p0 = scmp.ne.s32.totalorder %s905_s9, %s647_s30  ;;  %p649_p3 = pneg %p911_p13 }
  0x38   : > { %s652_s29 = scalar_lea.hbm %s1026_s1, 1536  ;;  %p653_p9 = scmp.lt.u32.totalorder %s905_s9, %s1026_s1 }
  0x39   : > { %p650_p5 = pnand %p649_p3, %p648_p0  ;;  %p654_p1 = scmp.lt.u32.totalorder %s652_s29, %s647_s30 }
  0x3a   : > { %p656_p4 = scmp.lt.u32.totalorder %s647_s30, %s905_s9 }
  0x3b   : > { %p651_p7 = pneg %p650_p5  ;;  %p655_p2 = por %p654_p1, %p653_p9 }
  0x3d   : > { %p657_p6 = por %p656_p4, %p655_p2 }
  0x3f   : > { %p658_p8 = pnand %p657_p6, %p651_p7 }
  0x41   : > { %661 = shalt.err (!%p658_p8)
}
  0x42   : > { %s662_s26 = scalar_lea.vmem %s907_s18, 512  ;;  %s768_s21 = smov [#allocation5]  }
  0x43   : > { %p663_p12 = scmp.ne.s32.totalorder %s907_s18, %s662_s26  ;;  %s667_s4 = sshll.u32 %s768_s21, 4  ;;  %s668_s4 = int_to_ptr.vmem [resolvable:$false] %s667_s4 }
  0x44   : > { %s669_s6 = scalar_lea.vmem %s668_s4, 1024  ;;  %p670_p5 = scmp.lt.s32.totalorder %s907_s18, %s668_s4 }
  0x45   : > { %p665_p10 = pnand %p663_p12, %p649_p3  ;;  %p671_p9 = scmp.lt.s32.totalorder %s669_s6, %s662_s26 }
  0x47   : > { %p666_p0 = pneg %p665_p10  ;;  %p672_p1 = por %p671_p9, %p670_p5 }
  0x49   : > { %p673_p2 = pnand %p672_p1, %p666_p0 }
  0x4b   : > { %676 = shalt.err (!%p673_p2)
}
  0x4c   : > { %557 = dma.hbm_to_vmem [thread:$0]  (!%p911_p13), %s905_s9, 512, %s907_s18, %s915_s25, %s766_s10, %s766_s10, %s767_s11  }
  0x4d   : > { %p1043_p3 = scmp.ne.s32.totalorder %s1037_s24, 0 }
  0x4e   : > { %p1044_p7 = scmp.ne.s32.totalorder (!%p1043_p3), %s1033_s20, 0 }
  0x4f   : > { %218 = sbr.rel (%p1043_p3) target bundleno = 332 (0x14c), region = 32 }
  0x56   : > { %730 = dma.done.wait (%p1044_p7), [#allocation3], 256  }
  0x57   : > { %732 = vsyncadd (%p1044_p7), [#allocation3], 4294967040  ;;  %s953_s30 = sand.u32 1, %s747_s13   ;;  %p1045_p4 = scmp.ne.s32.totalorder %s1035_s22, 0 }
  0x58   : > { %s505_s19 = sshll.u32 %s953_s30, 5  ;;  %s225_s29 = scalar_lea.sflag [#allocation6], %s953_s30 }
  0x59   : > { %s228_s7 = scalar_lea.vmem [#allocation5], %s505_s19 }
  0x5a   : > { %734 = dma.done.wait (%p1045_p4), %s225_s29, 512  }
  0x5b   : > { %736 = vsyncadd (%p1045_p4), %s225_s29, 4294966784  ;;  %vm278_vm0 = vcmask 261120   ;;  %v267_v0 = vld [vmem:[%s228_s7] sm:$0xff]  ;;  %v268_v1 = vld [vmem:[%s228_s7 + $0x8] sm:$0xff]  ;;  %p258_p13 = scmp.lt.s32.totalorder %s755_s15, 2  ;;  %s506_s20 = sshll.u32 %s953_s30, 4 }
  0x5c   : > { %v269_v2 = vld [vmem:[%s228_s7 + $0x10] sm:$0xff]  ;;  %v534_v3 = vpack.c.bf16 %v268_v1, %v267_v0  ;;  %v270_v4 = vld [vmem:[%s228_s7 + $0x18] sm:$0xff]  ;;  %s256_s9 = scalar_lea.vmem [#allocation7], %s506_s20  ;;  %s516_s25 = sshll.u32 %s755_s15, 8 }
  0x5d   : > { %v265_v5 = vld [vmem:[#allocation2] sm:$0xff]  ;;  %v538_v6 = vpack.c.bf16 %v270_v4, %v269_v2  ;;  %v266_v7 = vld [vmem:[#allocation2 + $0x8] sm:$0xff]  ;;  %s259_s22 = scalar_select %p258_p13, %s755_s15, 2 }
  0x5e   : > { %531 = vmatprep.mubr.msk.f32.mxu0 %vm278_vm0, %v265_v5  ;;  %535 = vmatprep.subr.bf16.mxu0 %v534_v3  ;;  %s379_s18 = sshll.u32 %s256_s9, 4  ;;  %s975_s21 = scalar_lea.hbm %s1028_s3, %s516_s25  ;;  %s970_s18 = int_to_ptr.vmem [resolvable:$true] %s379_s18 }
  0x5f   : > { %537 = vmatpush3.bf16.msra.mxu0 %v534_v3  ;;  %s263_s11 = scalar_lea.vmem %s1027_s2, %s259_s22  ;;  %s363_s4 = scalar_lea.sflag [#allocation4], %s953_s30 }
  0x60   : > { %539 = vmatprep.subr.bf16.mxu0 %v538_v6  ;;  %v507_v8 = vld [vmem:[%s263_s11] ss:$0 sm:$0xff]  ;;  %s677_s15 = scalar_lea.vmem %s970_s18, 256  ;;  %s769_s6 = smov [#allocation7]  }
  0x61   : > { %p678_p6 = scmp.ne.s32.totalorder %s970_s18, %s677_s15  ;;  %s681_s19 = sshll.u32 %s769_s6, 4  ;;  %s682_s19 = int_to_ptr.vmem [resolvable:$false] %s681_s19 }
  0x62   : > { %s683_s29 = scalar_lea.vmem %s682_s19, 512  ;;  %p684_p10 = scmp.lt.s32.totalorder %s970_s18, %s682_s19 }
  0x63   : > { %541 = vmatpush3.bf16.msra.mxu0 %v538_v6  ;;  %p679_p8 = pnand %p678_p6, %p890_p11  ;;  %p685_p0 = scmp.lt.s32.totalorder %s683_s29, %s677_s15 }
  0x65   : > { %p680_p12 = pneg %p679_p8  ;;  %p686_p5 = por %p685_p0, %p684_p10 }
  0x66   : > { %532 = vmatmul.mubr.msk.f32.vlgmr.msra.gmra.mrb[0].mxu0 %vm278_vm0, %v266_v7 }
  0x67   : > { %p687_p9 = pnand %p686_p5, %p680_p12 }
 0x139   : > { %v533_v9 = vpop.f32.mrb[0].mxu0 }
 0x13a   : > { %v357_v10 = vadd.f32 %v533_v9, %v507_v8  ;;  %v351_v11 = vpop.f32.mrb[1].mxu0 }
 0x13b   : > { %v352_v12 = vadd.f32 %v507_v8, %v351_v11 }
 0x13c   : > { %361 = vst.msk [vmem:[%s256_s9 + $0x8] sm:$0xff] %vm278_vm0, %v357_v10 }
 0x13d   : > { %360 = vst.msk [vmem:[%s256_s9] sm:$0xff] %vm278_vm0, %v352_v12 }
 0x13e   : > { %690 = shalt.err (!%p687_p9)
}
 0x13f   : > { %s691_s7 = scalar_lea.hbm %s975_s21, 256  ;;  %s695_s24 = scalar_lea.hbm %s1028_s3, 768 }
 0x140   : > { %p692_p1 = scmp.ne.s32.totalorder %s975_s21, %s691_s7  ;;  %p696_p7 = scmp.lt.u32.totalorder %s975_s21, %s1028_s3 }
 0x141   : > { %p697_p4 = scmp.lt.u32.totalorder %s695_s24, %s691_s7  ;;  %p699_p6 = scmp.lt.u32.totalorder %s691_s7, %s975_s21 }
 0x142   : > { %p693_p2 = pnand %p692_p1, %p890_p11 }
 0x143   : > { %p698_p13 = por %p697_p4, %p696_p7 }
 0x144   : > { %p694_p3 = pneg %p693_p2 }
 0x145   : > { %p700_p8 = por %p699_p6, %p698_p13 }
 0x147   : > { %p701_p12 = pnand %p700_p8, %p694_p3 }
 0x149   : > { %704 = shalt.err (!%p701_p12)
}
 0x14a   : > { %s770_s9 = smov 128   ;;  %s771_s25 = smov 8  }
 0x14b   : > { %548 = dma.vmem_to_hbm [thread:$0]  (%p890_p11), %s970_s18, 256, %s975_s21, %s363_s4, %s770_s9, %s770_s9, %s771_s25  }
 0x14c PF: > { %p565_p10 = scmp.ge.s32.totalorder %s763_s17, 2  ;;  %s394_s8 = sand.u32 1, %s743_s12  }
 0x14d   : > { %p1046_p0 = scmp.ne.s32.totalorder %s1036_s23, 0  ;;  %s395_s26 = scalar_lea.sflag [#allocation4], %s394_s8 }
 0x14f   : > { %p559_p5 = pnand %p565_p10, %p1046_p0 }
 0x151   : > { %738 = dma.done.wait (!%p559_p5), %s395_s26, 256  }
 0x152   : > { %740 = vsyncadd (!%p559_p5), %s395_s26, 4294967040  ;;  %s20_s17 = sadd.s32 1, %s763_s17   ;;  %s1047_s12 = smov %s747_s13 }
 0x153   : > { %p17_p9 = scmp.ge.s32.totalorder %s20_s17, 5   ;;  %s1048_s13 = smov %s751_s14 }
 0x154   : > { %s1049_s14 = smov %s899_s5  ;;  %s1050_s15 = smov %s759_s16 }
 0x155   : > { %s1051_s16 = smov %s1053_s28  ;;  %19 = sbr.rel (!%p17_p9) target bundleno = 7 (0x7), region = 86 }
 0x15c   :  { %400 = vsyncpa [#allocation3], 1 }
 0x15d   :  { %402 = vsyncpa [#allocation3 + $0x1], 1 }
 0x15e   :  { %403 = vsyncpa [#allocation6], 1 }
 0x15f   :  { %405 = vsyncpa [#allocation6 + $0x1], 1 }
 0x160   :  { %406 = vsyncpa [#allocation4], 1 }
 0x161   :  { %408 = vsyncpa [#allocation4 + $0x1], 1 }

</bundles_post_ra>
